<compile_context>
chip_gen: v7x
topology: tpu7x:2x2x1
jax: 0.10.0
libtpu: 0.0.40
codegen_flags: <defaults>
</compile_context>

<pallas_src>
import functools

import jax
import jax.numpy as jnp
from jax import lax
from jax.experimental import pallas as pl
from jax.experimental.pallas import tpu as pltpu

_LANE = 128
_SUBLANE = 8
_EPS = 1e-5
_VMEM_LIMIT = 32 * 1024 * 1024   # safe on v5e/v6e (128 MiB) and v7x (64 MiB)
_MAX_TILE_N = 512                # rows per tile (multiple of 128)


def _round_up(a, m):
    return (a + m - 1) // m * m


def _pad2d(a, rows, cols):
    r, c = a.shape
    return jnp.pad(a, ((0, rows - r), (0, cols - c)))


# ---------------------------------------------------------------------------
# Phase 1: per-channel sum and sum-of-squares of h = x @ W1 over all rows.
# ---------------------------------------------------------------------------
def _stats_kernel(x_ref, w1_ref, sum_ref, sumsq_ref):
    @pl.when(pl.program_id(0) == 0)
    def _():
        sum_ref[...] = jnp.zeros_like(sum_ref)
        sumsq_ref[...] = jnp.zeros_like(sumsq_ref)

    # bf16 MXU matmul, f32 accumulation.  (b1 omitted: cancelled by BN mean.)
    h = jnp.dot(x_ref[...], w1_ref[...], preferred_element_type=jnp.float32)
    sum_ref[...] = sum_ref[...] + jnp.sum(h, axis=0, keepdims=True)
    sumsq_ref[...] = sumsq_ref[...] + jnp.sum(h * h, axis=0, keepdims=True)


# ---------------------------------------------------------------------------
# Phase 2: h = x @ W1, fused BN (scale/shift), ReLU, out = relu(h) @ W2 + b2.
# ---------------------------------------------------------------------------
def _mlp_out_kernel(x_ref, w1_ref, scale_ref, shift_ref, w2_ref, b2_ref, o_ref):
    h = jnp.dot(x_ref[...], w1_ref[...], preferred_element_type=jnp.float32)
    h = h * scale_ref[...] + shift_ref[...]        # fused BatchNorm affine (f32)
    h = jnp.maximum(h, 0.0)                        # ReLU
    out = jnp.dot(h.astype(jnp.bfloat16), w2_ref[...],
                  preferred_element_type=jnp.float32)
    o_ref[...] = (out + b2_ref[...]).astype(o_ref.dtype)


@jax.jit
def mlp_layer_forward(x, params):
    """x: (B, S, input_dim) float32. Returns (B, S, output_dim) float32."""
    B, S, d_in = x.shape
    w1, b1, gamma, beta, w2, b2 = params
    del b1  # linear_1 bias is a mathematical no-op under train-mode BatchNorm.
    hidden = w1.shape[1]
    d_out = w2.shape[1]
    n = B * S

    # --- pad to lane/sublane friendly shapes (zero padding is stat-neutral) --
    d_in_p = _round_up(d_in, _LANE)
    h_p = _round_up(hidden, _LANE)
    d_out_p = _round_up(d_out, _LANE)
    if n <= _MAX_TILE_N:
        tile_n = _round_up(n, _SUBLANE)
        n_p = tile_n
    else:
        tile_n = _MAX_TILE_N
        n_p = _round_up(n, tile_n)
    n_tiles = n_p // tile_n

    x2d = _pad2d(x.reshape(n, d_in), n_p, d_in_p).astype(jnp.bfloat16)
    w1_p = _pad2d(w1, d_in_p, h_p).astype(jnp.bfloat16)
    w2_p = _pad2d(w2, h_p, d_out_p).astype(jnp.bfloat16)
    gamma_p = _pad2d(gamma.reshape(1, hidden), 1, h_p)
    beta_p = _pad2d(beta.reshape(1, hidden), 1, h_p)
    b2_p = _pad2d(b2.reshape(1, d_out), 1, d_out_p)

    def resident_spec(shape):
        # Constant index_map: tile stays VMEM-resident across all row tiles.
        return pl.BlockSpec(shape, lambda i: (0, 0))

    # --- phase 1: global per-channel batch statistics ------------------------
    h_sum, h_sumsq = pl.pallas_call(
        _stats_kernel,
        out_shape=(jax.ShapeDtypeStruct((1, h_p), jnp.float32),
                   jax.ShapeDtypeStruct((1, h_p), jnp.float32)),
        grid_spec=pltpu.PrefetchScalarGridSpec(
            num_scalar_prefetch=0,
            grid=(n_tiles,),
            in_specs=[
                pl.BlockSpec((tile_n, d_in_p), lambda i: (i, 0)),
                resident_spec((d_in_p, h_p)),
            ],
            out_specs=(
                resident_spec((1, h_p)),
                resident_spec((1, h_p)),
            ),
        ),
        compiler_params=pltpu.CompilerParams(
            dimension_semantics=("arbitrary",),       # stats accumulation axis
            vmem_limit_bytes=_VMEM_LIMIT),
    )(x2d, w1_p)

    # Fold BatchNorm into a single per-channel scale / shift (tiny f32 XLA op).
    mean = h_sum / n                                   # divide by REAL row count
    var = jnp.maximum(h_sumsq / n - mean * mean, 0.0)  # biased (training mode)
    inv_std = lax.rsqrt(var + _EPS)
    scale = gamma_p * inv_std
    shift = beta_p - mean * scale

    # --- phase 2: normalize + ReLU + second matmul, independent row tiles ----
    out_p = pl.pallas_call(
        _mlp_out_kernel,
        out_shape=jax.ShapeDtypeStruct((n_p, d_out_p), jnp.float32),
        grid_spec=pltpu.PrefetchScalarGridSpec(
            num_scalar_prefetch=0,
            grid=(n_tiles,),
            in_specs=[
                pl.BlockSpec((tile_n, d_in_p), lambda i: (i, 0)),
                resident_spec((d_in_p, h_p)),
                resident_spec((1, h_p)),
                resident_spec((1, h_p)),
                resident_spec((h_p, d_out_p)),
                resident_spec((1, d_out_p)),
            ],
            out_specs=pl.BlockSpec((tile_n, d_out_p), lambda i: (i, 0)),
        ),
        compiler_params=pltpu.CompilerParams(
            dimension_semantics=("parallel",),         # megacore-shardable
            vmem_limit_bytes=_VMEM_LIMIT),
    )(x2d, w1_p, scale, shift, w2_p, b2_p)

    return out_p[:n, :d_out].reshape(B, S, d_out)


def init_params(key, input_dim, output_dim):
    """Deterministic init mimicking PyTorch defaults (uniform +-1/sqrt(fan_in))."""
    hidden = output_dim * 4
    k1, k2, k3, k4 = jax.random.split(key, 4)

    bound1 = 1.0 / jnp.sqrt(input_dim)
    # Stored pre-transposed: (in, out) so the kernel does x @ W directly.
    w1 = jax.random.uniform(k1, (input_dim, hidden), jnp.float32,
                            -bound1, bound1)
    b1 = jax.random.uniform(k2, (1, hidden), jnp.float32, -bound1, bound1)

    # BatchNorm1d affine params: gamma=1, beta=0 (PyTorch defaults).
    gamma = jnp.ones((1, hidden), jnp.float32)
    beta = jnp.zeros((1, hidden), jnp.float32)

    bound2 = 1.0 / jnp.sqrt(hidden)
    w2 = jax.random.uniform(k3, (hidden, output_dim), jnp.float32,
                            -bound2, bound2)
    b2 = jax.random.uniform(k4, (1, output_dim), jnp.float32, -bound2, bound2)

    return (w1, b1, gamma, beta, w2, b2)


if __name__ == "__main__":
    key = jax.random.PRNGKey(0)
    k_x, k_p = jax.random.split(key)

    B, S = 2, 8
    input_dim, output_dim = 32, 32   # hidden = 4 * output_dim = 128

    x = jax.random.normal(k_x, (B, S, input_dim), jnp.float32)
    params = init_params(k_p, input_dim, output_dim)

    out = mlp_layer_forward(x, params)
    out = jax.block_until_ready(out)
    assert out.shape == (B, S, output_dim), out.shape

    # Pure-JAX f32 reference of the PyTorch semantics (includes b1, which the
    # kernel drops because train-mode BatchNorm cancels it exactly).
    # Tolerance is loosened because the kernel feeds bf16 operands to the MXU.
    w1, b1, gamma, beta, w2, b2 = params
    h = x.reshape(B * S, input_dim) @ w1 + b1
    mean = h.mean(axis=0, keepdims=True)
    var = ((h - mean) ** 2).mean(axis=0, keepdims=True)
    h = (h - mean) / jnp.sqrt(var + 1e-5) * gamma + beta
    h = jnp.maximum(h, 0.0)
    ref = (h @ w2 + b2).reshape(B, S, output_dim)
    assert jnp.allclose(out, ref, atol=5e-2, rtol=5e-2), (
        float(jnp.max(jnp.abs(out - ref))))

    print("KERNEL_OK")
</pallas_src>

<mosaic_0001>
module attributes {stable_mosaic.version = 11 : i64} {
  func.func @_mlp_out_kernel(%arg0: i32, %arg1: memref<16x128xbf16, #tpu.memory_space<vmem>>, %arg2: memref<128x128xbf16, #tpu.memory_space<vmem>>, %arg3: memref<1x128xf32, #tpu.memory_space<vmem>>, %arg4: memref<1x128xf32, #tpu.memory_space<vmem>>, %arg5: memref<128x128xbf16, #tpu.memory_space<vmem>>, %arg6: memref<1x128xf32, #tpu.memory_space<vmem>>, %arg7: memref<16x128xf32, #tpu.memory_space<vmem>>) attributes {dimension_semantics = [#tpu.dimension_semantics<parallel>], iteration_bounds = array<i64: 1>, scalar_prefetch = 0 : i64, scratch_operands = 0 : i64, tpu.core_type = #tpu.core_type<tc>, window_params = [{transform_indices = @transform_0, window_bounds = array<i64: 16, 128>}, {pipeline_mode = #tpu.pipeline_mode<synchronous>, transform_indices = @transform_1, window_bounds = array<i64: 128, 128>}, {pipeline_mode = #tpu.pipeline_mode<synchronous>, transform_indices = @transform_2, window_bounds = array<i64: 1, 128>}, {pipeline_mode = #tpu.pipeline_mode<synchronous>, transform_indices = @transform_3, window_bounds = array<i64: 1, 128>}, {pipeline_mode = #tpu.pipeline_mode<synchronous>, transform_indices = @transform_4, window_bounds = array<i64: 128, 128>}, {pipeline_mode = #tpu.pipeline_mode<synchronous>, transform_indices = @transform_5, window_bounds = array<i64: 1, 128>}, {transform_indices = @transform_6, window_bounds = array<i64: 16, 128>}]} {
    %c0 = arith.constant 0 : index
    %c0_0 = arith.constant 0 : index
    %0 = vector.load %arg1[%c0, %c0_0] : memref<16x128xbf16, #tpu.memory_space<vmem>>, vector<16x128xbf16>
    %c0_1 = arith.constant 0 : index
    %c0_2 = arith.constant 0 : index
    %1 = vector.load %arg2[%c0_1, %c0_2] : memref<128x128xbf16, #tpu.memory_space<vmem>>, vector<128x128xbf16>
    %cst = arith.constant dense<0.000000e+00> : vector<16x128xf32>
    %2 = tpu.matmul %0, %1, %cst {dimension_numbers = #tpu.dot_dimension_numbers<[1], [0], [0], [1], [0, 0, 1, 1], [], []>} : vector<16x128xbf16>, vector<128x128xbf16>, vector<16x128xf32> -> vector<16x128xf32>
    %c0_3 = arith.constant 0 : index
    %c0_4 = arith.constant 0 : index
    %3 = vector.load %arg3[%c0_3, %c0_4] : memref<1x128xf32, #tpu.memory_space<vmem>>, vector<1x128xf32>
    %4 = vector.broadcast %3 : vector<1x128xf32> to vector<16x128xf32>
    %5 = arith.mulf %2, %4 : vector<16x128xf32>
    %c0_5 = arith.constant 0 : index
    %c0_6 = arith.constant 0 : index
    %6 = vector.load %arg4[%c0_5, %c0_6] : memref<1x128xf32, #tpu.memory_space<vmem>>, vector<1x128xf32>
    %7 = vector.broadcast %6 : vector<1x128xf32> to vector<16x128xf32>
    %8 = arith.addf %5, %7 : vector<16x128xf32>
    %cst_7 = arith.constant 0.000000e+00 : f32
    %9 = vector.broadcast %cst_7 : f32 to vector<16x128xf32>
    %10 = arith.maximumf %8, %9 : vector<16x128xf32>
    %11 = arith.truncf %10 : vector<16x128xf32> to vector<16x128xbf16>
    %c0_8 = arith.constant 0 : index
    %c0_9 = arith.constant 0 : index
    %12 = vector.load %arg5[%c0_8, %c0_9] : memref<128x128xbf16, #tpu.memory_space<vmem>>, vector<128x128xbf16>
    %cst_10 = arith.constant dense<0.000000e+00> : vector<16x128xf32>
    %13 = tpu.matmul %11, %12, %cst_10 {dimension_numbers = #tpu.dot_dimension_numbers<[1], [0], [0], [1], [0, 0, 1, 1], [], []>} : vector<16x128xbf16>, vector<128x128xbf16>, vector<16x128xf32> -> vector<16x128xf32>
    %c0_11 = arith.constant 0 : index
    %c0_12 = arith.constant 0 : index
    %14 = vector.load %arg6[%c0_11, %c0_12] : memref<1x128xf32, #tpu.memory_space<vmem>>, vector<1x128xf32>
    %15 = vector.broadcast %14 : vector<1x128xf32> to vector<16x128xf32>
    %16 = arith.addf %13, %15 : vector<16x128xf32>
    %c0_13 = arith.constant 0 : index
    %c0_14 = arith.constant 0 : index
    %17 = vector.load %arg7[%c0_13, %c0_14] : memref<16x128xf32, #tpu.memory_space<vmem>>, vector<16x128xf32>
    tpu.vector_store %arg7[%c0_13, %c0_14], %16 {strides = array<i32>} : memref<16x128xf32, #tpu.memory_space<vmem>>, vector<16x128xf32>,
    return
  }
  func.func @transform_0(%arg0: i32) -> (i32, i32) {
    %c0_i32 = arith.constant 0 : i32
    %c0_i32_0 = arith.constant 0 : i32
    return %arg0, %c0_i32 : i32, i32
  }
  func.func @transform_1(%arg0: i32) -> (i32, i32) {
    %c0_i32 = arith.constant 0 : i32
    %c0_i32_0 = arith.constant 0 : i32
    %c0_i32_1 = arith.constant 0 : i32
    return %c0_i32, %c0_i32_0 : i32, i32
  }
  func.func @transform_2(%arg0: i32) -> (i32, i32) {
    %c0_i32 = arith.constant 0 : i32
    %c0_i32_0 = arith.constant 0 : i32
    %c0_i32_1 = arith.constant 0 : i32
    return %c0_i32, %c0_i32_0 : i32, i32
  }
  func.func @transform_3(%arg0: i32) -> (i32, i32) {
    %c0_i32 = arith.constant 0 : i32
    %c0_i32_0 = arith.constant 0 : i32
    %c0_i32_1 = arith.constant 0 : i32
    return %c0_i32, %c0_i32_0 : i32, i32
  }
  func.func @transform_4(%arg0: i32) -> (i32, i32) {
    %c0_i32 = arith.constant 0 : i32
    %c0_i32_0 = arith.constant 0 : i32
    %c0_i32_1 = arith.constant 0 : i32
    return %c0_i32, %c0_i32_0 : i32, i32
  }
  func.func @transform_5(%arg0: i32) -> (i32, i32) {
    %c0_i32 = arith.constant 0 : i32
    %c0_i32_0 = arith.constant 0 : i32
    %c0_i32_1 = arith.constant 0 : i32
    return %c0_i32, %c0_i32_0 : i32, i32
  }
  func.func @transform_6(%arg0: i32) -> (i32, i32) {
    %c0_i32 = arith.constant 0 : i32
    %c0_i32_0 = arith.constant 0 : i32
    return %arg0, %c0_i32 : i32, i32
  }
}

module attributes {stable_mosaic.version = 11 : i64} {
  func.func @_stats_kernel(%arg0: i32, %arg1: memref<16x128xbf16, #tpu.memory_space<vmem>>, %arg2: memref<128x128xbf16, #tpu.memory_space<vmem>>, %arg3: memref<1x128xf32, #tpu.memory_space<vmem>>, %arg4: memref<1x128xf32, #tpu.memory_space<vmem>>) attributes {dimension_semantics = [#tpu.dimension_semantics<arbitrary>], iteration_bounds = array<i64: 1>, scalar_prefetch = 0 : i64, scratch_operands = 0 : i64, tpu.core_type = #tpu.core_type<tc>, window_params = [{transform_indices = @transform_0, window_bounds = array<i64: 16, 128>}, {pipeline_mode = #tpu.pipeline_mode<synchronous>, transform_indices = @transform_1, window_bounds = array<i64: 128, 128>}, {pipeline_mode = #tpu.pipeline_mode<synchronous>, transform_indices = @transform_2, window_bounds = array<i64: 1, 128>}, {pipeline_mode = #tpu.pipeline_mode<synchronous>, transform_indices = @transform_3, window_bounds = array<i64: 1, 128>}]} {
    %c0_i32 = arith.constant 0 : i32
    %0 = arith.cmpi eq, %arg0, %c0_i32 : i32
    %1 = arith.extui %0 : i1 to i32
    %c0_i32_0 = arith.constant 0 : i32
    %2 = arith.cmpi ne, %1, %c0_i32_0 : i32
    scf.if %2 {
      %cst_14 = arith.constant 0.000000e+00 : f32
      %17 = vector.broadcast %cst_14 : f32 to vector<1x128xf32>
      %c0_15 = arith.constant 0 : index
      %c0_16 = arith.constant 0 : index
      %18 = vector.load %arg3[%c0_15, %c0_16] : memref<1x128xf32, #tpu.memory_space<vmem>>, vector<1x128xf32>
      tpu.vector_store %arg3[%c0_15, %c0_16], %17 {strides = array<i32>} : memref<1x128xf32, #tpu.memory_space<vmem>>, vector<1x128xf32>,
      %cst_17 = arith.constant 0.000000e+00 : f32
      %19 = vector.broadcast %cst_17 : f32 to vector<1x128xf32>
      %c0_18 = arith.constant 0 : index
      %c0_19 = arith.constant 0 : index
      %20 = vector.load %arg4[%c0_18, %c0_19] : memref<1x128xf32, #tpu.memory_space<vmem>>, vector<1x128xf32>
      tpu.vector_store %arg4[%c0_18, %c0_19], %19 {strides = array<i32>} : memref<1x128xf32, #tpu.memory_space<vmem>>, vector<1x128xf32>,
    } else {
    }
    %c0 = arith.constant 0 : index
    %c0_1 = arith.constant 0 : index
    %3 = vector.load %arg1[%c0, %c0_1] : memref<16x128xbf16, #tpu.memory_space<vmem>>, vector<16x128xbf16>
    %c0_2 = arith.constant 0 : index
    %c0_3 = arith.constant 0 : index
    %4 = vector.load %arg2[%c0_2, %c0_3] : memref<128x128xbf16, #tpu.memory_space<vmem>>, vector<128x128xbf16>
    %cst = arith.constant dense<0.000000e+00> : vector<16x128xf32>
    %5 = tpu.matmul %3, %4, %cst {dimension_numbers = #tpu.dot_dimension_numbers<[1], [0], [0], [1], [0, 0, 1, 1], [], []>} : vector<16x128xbf16>, vector<128x128xbf16>, vector<16x128xf32> -> vector<16x128xf32>
    %c0_4 = arith.constant 0 : index
    %c0_5 = arith.constant 0 : index
    %6 = vector.load %arg3[%c0_4, %c0_5] : memref<1x128xf32, #tpu.memory_space<vmem>>, vector<1x128xf32>
    %cst_6 = arith.constant dense<0.000000e+00> : vector<128xf32>
    %7 = vector.multi_reduction <add>, %5, %cst_6 [0] : vector<16x128xf32> to vector<128xf32>
    %8 = vector.shape_cast %7 : vector<128xf32> to vector<1x128xf32>
    %9 = arith.addf %6, %8 : vector<1x128xf32>
    %c0_7 = arith.constant 0 : index
    %c0_8 = arith.constant 0 : index
    %10 = vector.load %arg3[%c0_7, %c0_8] : memref<1x128xf32, #tpu.memory_space<vmem>>, vector<1x128xf32>
    tpu.vector_store %arg3[%c0_7, %c0_8], %9 {strides = array<i32>} : memref<1x128xf32, #tpu.memory_space<vmem>>, vector<1x128xf32>,
    %c0_9 = arith.constant 0 : index
    %c0_10 = arith.constant 0 : index
    %11 = vector.load %arg4[%c0_9, %c0_10] : memref<1x128xf32, #tpu.memory_space<vmem>>, vector<1x128xf32>
    %12 = arith.mulf %5, %5 : vector<16x128xf32>
    %cst_11 = arith.constant dense<0.000000e+00> : vector<128xf32>
    %13 = vector.multi_reduction <add>, %12, %cst_11 [0] : vector<16x128xf32> to vector<128xf32>
    %14 = vector.shape_cast %13 : vector<128xf32> to vector<1x128xf32>
    %15 = arith.addf %11, %14 : vector<1x128xf32>
    %c0_12 = arith.constant 0 : index
    %c0_13 = arith.constant 0 : index
    %16 = vector.load %arg4[%c0_12, %c0_13] : memref<1x128xf32, #tpu.memory_space<vmem>>, vector<1x128xf32>
    tpu.vector_store %arg4[%c0_12, %c0_13], %15 {strides = array<i32>} : memref<1x128xf32, #tpu.memory_space<vmem>>, vector<1x128xf32>,
    return
  }
  func.func @transform_0(%arg0: i32) -> (i32, i32) {
    %c0_i32 = arith.constant 0 : i32
    %c0_i32_0 = arith.constant 0 : i32
    return %arg0, %c0_i32 : i32, i32
  }
  func.func @transform_1(%arg0: i32) -> (i32, i32) {
    %c0_i32 = arith.constant 0 : i32
    %c0_i32_0 = arith.constant 0 : i32
    %c0_i32_1 = arith.constant 0 : i32
    return %c0_i32, %c0_i32_0 : i32, i32
  }
  func.func @transform_2(%arg0: i32) -> (i32, i32) {
    %c0_i32 = arith.constant 0 : i32
    %c0_i32_0 = arith.constant 0 : i32
    %c0_i32_1 = arith.constant 0 : i32
    return %c0_i32, %c0_i32_0 : i32, i32
  }
  func.func @transform_3(%arg0: i32) -> (i32, i32) {
    %c0_i32 = arith.constant 0 : i32
    %c0_i32_0 = arith.constant 0 : i32
    %c0_i32_1 = arith.constant 0 : i32
    return %c0_i32, %c0_i32_0 : i32, i32
  }
}

</mosaic_0001>

<bundles_post_ra>
// kernel: mlp_layer_forward.3
= control target key start
LH: loop header
LB: loop body
LE: loop exit
PB: predicated region body
PF: predicated region fallthrough
CT: control target
= control target key end

     0   :  { %v373_v0 = vmov 0.0   ;;  %vm374_vm0 = vmmov 0   ;;  %s476_s1 = inlined_call_operand.vmem [shape: bf16[128,128], index: 1, kind: input, shape index: {}]   ;;  %s477_s4 = inlined_call_operand.vmem [shape: bf16[128,128], index: 4, kind: input, shape index: {}]   ;;  %s478_s0 = inlined_call_operand.vmem [shape: bf16[16,128], index: 0, kind: input, shape index: {}]   ;;  %s479_s2 = inlined_call_operand.vmem [shape: f32[1,128], index: 2, kind: input, shape index: {}]   ;;  %s480_s3 = inlined_call_operand.vmem [shape: f32[1,128], index: 3, kind: input, shape index: {}]   ;;  %s481_s5 = inlined_call_operand.vmem [shape: f32[1,128], index: 5, kind: input, shape index: {}]   ;;  %s482_s6 = inlined_call_operand.vmem [shape: f32[16,128], index: 6, kind: output, shape index: {}]  }
   0x1   :  { %314 = vmatprep.subr.bf16.mxu0 %v373_v0  ;;  %v356_v1 = vld [vmem:[%s476_s1] sm:$0xff]   ;;  %330 = vmatprep.mubr.msk.bf16.mxu0 %vm374_vm0, %v373_v0  ;;  %v357_v2 = vld [vmem:[%s476_s1 + $0x8] sm:$0xff]   ;;  %v358_v3 = vld [vmem:[%s476_s1 + $0x10] sm:$0xff]  }
   0x2   :  { %334 = vmatprep.subr.bf16.mxu1 %v373_v0  ;;  %350 = vmatprep.mubr.msk.bf16.mxu1 %vm374_vm0, %v373_v0  ;;  %v365_v4 = vld [vmem:[%s477_s4] sm:$0xff]   ;;  %v359_v5 = vld [vmem:[%s476_s1 + $0x18] sm:$0xff]   ;;  %v366_v6 = vld [vmem:[%s477_s4 + $0x8] sm:$0xff]  }
   0x3   :  { %315 = vmatpush3.bf16.msra.mxu0 %v356_v1  ;;  %335 = vmatpush3.bf16.msra.mxu1 %v365_v4  ;;  %v360_v7 = vld [vmem:[%s476_s1 + $0x20] sm:$0xff]   ;;  %v367_v8 = vld [vmem:[%s477_s4 + $0x10] sm:$0xff]   ;;  %v361_v9 = vld [vmem:[%s476_s1 + $0x28] sm:$0xff]  }
   0x4   :  { %316 = vmatprep.subr.bf16.mxu0 %v373_v0  ;;  %336 = vmatprep.subr.bf16.mxu1 %v373_v0  ;;  %v368_v10 = vld [vmem:[%s477_s4 + $0x18] sm:$0xff]   ;;  %v362_v11 = vld [vmem:[%s476_s1 + $0x30] sm:$0xff]   ;;  %v369_v12 = vld [vmem:[%s477_s4 + $0x20] sm:$0xff]  }
   0x5   :  { %v363_v13 = vld [vmem:[%s476_s1 + $0x38] sm:$0xff]   ;;  %v364_v14 = vld [vmem:[%s478_s0] sm:$0xff]   ;;  %v370_v15 = vld [vmem:[%s477_s4 + $0x28] sm:$0xff]  }
   0x6   :  { %v371_v16 = vld [vmem:[%s477_s4 + $0x30] sm:$0xff]   ;;  %v372_v17 = vld [vmem:[%s477_s4 + $0x38] sm:$0xff]   ;;  %v285_v18 = vld [vmem:[%s479_s2] ss:$0 sm:$0xff] }
   0x7   :  { %317 = vmatpush3.bf16.msra.mxu0 %v357_v2  ;;  %337 = vmatpush3.bf16.msra.mxu1 %v366_v6  ;;  %v286_v20 = vld [vmem:[%s480_s3] ss:$0 sm:$0xff] }
   0x8   :  { %318 = vmatprep.subr.bf16.mxu0 %v373_v0  ;;  %338 = vmatprep.subr.bf16.mxu1 %v373_v0  ;;  %v287_v31 = vld [vmem:[%s481_s5] ss:$0 sm:$0xff] }
   0xb   :  { %319 = vmatpush3.bf16.msra.mxu0 %v358_v3  ;;  %339 = vmatpush3.bf16.msra.mxu1 %v367_v8 }
   0xc   :  { %320 = vmatprep.subr.bf16.mxu0 %v373_v0  ;;  %340 = vmatprep.subr.bf16.mxu1 %v373_v0 }
   0xf   :  { %321 = vmatpush3.bf16.msra.mxu0 %v359_v5  ;;  %341 = vmatpush3.bf16.msra.mxu1 %v368_v10 }
  0x10   :  { %322 = vmatprep.subr.bf16.mxu0 %v373_v0  ;;  %342 = vmatprep.subr.bf16.mxu1 %v373_v0 }
  0x13   :  { %323 = vmatpush3.bf16.msra.mxu0 %v360_v7  ;;  %343 = vmatpush3.bf16.msra.mxu1 %v369_v12 }
  0x14   :  { %324 = vmatprep.subr.bf16.mxu0 %v373_v0  ;;  %344 = vmatprep.subr.bf16.mxu1 %v373_v0 }
  0x17   :  { %325 = vmatpush3.bf16.msra.mxu0 %v361_v9  ;;  %345 = vmatpush3.bf16.msra.mxu1 %v370_v15 }
  0x18   :  { %326 = vmatprep.subr.bf16.mxu0 %v373_v0  ;;  %346 = vmatprep.subr.bf16.mxu1 %v373_v0 }
  0x1b   :  { %327 = vmatpush3.bf16.msra.mxu0 %v362_v11  ;;  %347 = vmatpush3.bf16.msra.mxu1 %v371_v16 }
  0x1c   :  { %328 = vmatprep.subr.bf16.mxu0 %v373_v0  ;;  %348 = vmatprep.subr.bf16.mxu1 %v373_v0 }
  0x1f   :  { %329 = vmatpush3.bf16.msra.mxu0 %v363_v13  ;;  %349 = vmatpush3.bf16.msra.mxu1 %v372_v17 }
  0x22   :  { %331 = vmatmul.mubr.bf16.vlgmr.msra.gmra.mrb[0].mxu0 %v364_v14 }
  0xf5   :  { %v130_v19 = vpop.f32.mrb[0].mxu0 }
  0xf6   :  { %v144_v21 = vmul.f32 %v285_v18, %v130_v19  ;;  %v332_v22 = vpop.f32.mrb[1].mxu0 }
  0xf7   :  { %v133_v23 = vpop.f32.mrb[2].mxu0 }
  0xf8   :  { %v153_v24 = vadd.f32 %v286_v20, %v144_v21  ;;  %v145_v25 = vmul.f32 %v285_v18, %v133_v23  ;;  %v333_v26 = vpop.f32.mrb[3].mxu0 }
  0xfa   :  { %v154_v27 = vadd.f32 %v286_v20, %v145_v25  ;;  %v155_v28 = vmax.f32 %v153_v24, 0.0 }
  0xfc   :  { %v156_v29 = vmax.f32 %v154_v27, 0.0 }
  0xfe   :  { %v157_v30 = vpack.c.bf16 %v156_v29, %v155_v28 }
 0x100   :  { %351 = vmatmul.mubr.bf16.vlgmr.msra.gmra.mrb[0].mxu1 %v157_v30 }
 0x1d3   :  { %v263_v32 = vpop.f32.mrb[0].mxu1 }
 0x1d4   :  { %v264_v33 = vadd.f32 %v287_v31, %v263_v32  ;;  %v352_v34 = vpop.f32.mrb[1].mxu1 }
 0x1d5   :  { %v266_v35 = vpop.f32.mrb[2].mxu1 }
 0x1d6   :  { %270 = vst [vmem:[%s482_s6] sm:$0xff] %v264_v33  ;;  %v267_v36 = vadd.f32 %v287_v31, %v266_v35  ;;  %v353_v37 = vpop.f32.mrb[3].mxu1 }
 0x1d8   :  { %271 = vst [vmem:[%s482_s6 + $0x8] sm:$0xff] %v267_v36 }

// kernel: mlp_layer_forward.2
= control target key start
LH: loop header
LB: loop body
LE: loop exit
PB: predicated region body
PF: predicated region fallthrough
CT: control target
= control target key end

     0   :  { %v212_v0 = vmov 0.0   ;;  %vm213_vm0 = vmmov 0   ;;  %s279_s1 = inlined_call_operand.vmem [shape: bf16[128,128], index: 1, kind: input, shape index: {}]   ;;  %s280_s0 = inlined_call_operand.vmem [shape: bf16[16,128], index: 0, kind: input, shape index: {}]   ;;  %s281_s2 = inlined_call_operand.vmem [shape: f32[1,128], index: 2, kind: output, shape index: {0}]   ;;  %s282_s3 = inlined_call_operand.vmem [shape: f32[1,128], index: 3, kind: output, shape index: {1}]  }
   0x1   :  { %181 = vmatprep.subr.bf16.mxu0 %v212_v0  ;;  %v203_v1 = vld [vmem:[%s279_s1] sm:$0xff]   ;;  %197 = vmatprep.mubr.msk.bf16.mxu0 %vm213_vm0, %v212_v0  ;;  %v204_v2 = vld [vmem:[%s279_s1 + $0x8] sm:$0xff]   ;;  %v205_v3 = vld [vmem:[%s279_s1 + $0x10] sm:$0xff]   ;;  %18 = vst [vmem:[%s281_s2] sm:$0x1] %v212_v0 }
   0x2   :  { %182 = vmatpush3.bf16.msra.mxu0 %v203_v1  ;;  %v206_v4 = vld [vmem:[%s279_s1 + $0x18] sm:$0xff]   ;;  %v207_v5 = vld [vmem:[%s279_s1 + $0x20] sm:$0xff]   ;;  %v208_v6 = vld [vmem:[%s279_s1 + $0x28] sm:$0xff]   ;;  %19 = vst [vmem:[%s282_s3] sm:$0x1] %v212_v0 }
   0x3   :  { %183 = vmatprep.subr.bf16.mxu0 %v212_v0  ;;  %v209_v7 = vld [vmem:[%s279_s1 + $0x30] sm:$0xff]   ;;  %v210_v8 = vld [vmem:[%s279_s1 + $0x38] sm:$0xff]   ;;  %v211_v9 = vld [vmem:[%s280_s0] sm:$0xff]  }
   0x6   :  { %184 = vmatpush3.bf16.msra.mxu0 %v204_v2 }
   0x7   :  { %185 = vmatprep.subr.bf16.mxu0 %v212_v0 }
   0x8   :  { %v133_v27 = vld [vmem:[%s281_s2] sm:$0x1] }
   0x9   :  { %v143_v30 = vld [vmem:[%s282_s3] sm:$0x1] }
   0xa   :  { %186 = vmatpush3.bf16.msra.mxu0 %v205_v3 }
   0xb   :  { %187 = vmatprep.subr.bf16.mxu0 %v212_v0 }
   0xe   :  { %188 = vmatpush3.bf16.msra.mxu0 %v206_v4 }
   0xf   :  { %189 = vmatprep.subr.bf16.mxu0 %v212_v0 }
  0x12   :  { %190 = vmatpush3.bf16.msra.mxu0 %v207_v5 }
  0x13   :  { %191 = vmatprep.subr.bf16.mxu0 %v212_v0 }
  0x16   :  { %192 = vmatpush3.bf16.msra.mxu0 %v208_v6 }
  0x17   :  { %193 = vmatprep.subr.bf16.mxu0 %v212_v0 }
  0x1a   :  { %194 = vmatpush3.bf16.msra.mxu0 %v209_v7 }
  0x1b   :  { %195 = vmatprep.subr.bf16.mxu0 %v212_v0 }
  0x1e   :  { %196 = vmatpush3.bf16.msra.mxu0 %v210_v8 }
  0x21   :  { %198 = vmatmul.mubr.bf16.vlgmr.msra.gmra.mrb[0].mxu0 %v211_v9 }
  0xf4   :  { %v126_v10 = vpop.f32.mrb[0].mxu0 }
  0xf5   :  { %v199_v11 = vpop.f32.mrb[1].mxu0  ;;  %v144_v13 = vmul.f32 %v126_v10, %v126_v10 }
  0xf6   :  { %v129_v12 = vpop.f32.mrb[2].mxu0 }
  0xf7   :  { %v134_v14 = vadd.f32 %v129_v12, %v126_v10  ;;  %v145_v15 = vmul.f32 %v129_v12, %v129_v12  ;;  %v200_v16 = vpop.f32.mrb[3].mxu0 }
  0xf9   :  { %v135_v17 = vrot.slane %v134_v14, 4  ;;  %v146_v18 = vadd.f32 %v145_v15, %v144_v13 }
  0xfb   :  { %v136_v19 = vadd.f32 %v135_v17, %v134_v14  ;;  %v147_v20 = vrot.slane %v146_v18, 4 }
  0xfd   :  { %v137_v21 = vrot.slane %v136_v19, 2  ;;  %v148_v22 = vadd.f32 %v147_v20, %v146_v18 }
  0xff   :  { %v138_v23 = vadd.f32 %v137_v21, %v136_v19  ;;  %v149_v24 = vrot.slane %v148_v22, 2 }
 0x101   :  { %v139_v25 = vrot.slane %v138_v23, 1  ;;  %v150_v26 = vadd.f32 %v149_v24, %v148_v22 }
 0x103   :  { %v140_v28 = vadd.f32 %v139_v25, %v138_v23  ;;  %v151_v29 = vrot.slane %v150_v26, 1 }
 0x105   :  { %v141_v31 = vadd.f32 %v140_v28, %v133_v27  ;;  %v152_v32 = vadd.f32 %v151_v29, %v150_v26 }
 0x107   :  { %142 = vst [vmem:[%s281_s2] sm:$0x1] %v141_v31  ;;  %v153_v33 = vadd.f32 %v152_v32, %v143_v30 }
 0x109   :  { %154 = vst [vmem:[%s282_s3] sm:$0x1] %v153_v33 }

</bundles_post_ra>
